<compile_context>
chip_gen: v6e
topology: v6e:2x2x1
jax: 0.10.0
libtpu: 0.0.40
codegen_flags: <defaults>
</compile_context>

<pallas_src>
import math

import jax
import jax.numpy as jnp
from jax.experimental import pallas as pl
from jax.experimental.pallas import tpu as pltpu

EPS = 1e-5          # config.eps
NEG_INF = -1e30


def _pick_tile(n, candidates):
    for c in candidates:
        if n % c == 0:
            return c
    return n


def _tpu_vmem_capacity_bytes():
    try:
        return int(pltpu.get_tpu_info().vmem_capacity_bytes)
    except Exception:
        return 128 * 1024 * 1024      # v5e / v6e default


# ----------------------------------------------------------------------------
# Row-tiled fused QKV projection: y = x @ W + b  (bf16 MXU operands, f32 accumulate)
# ----------------------------------------------------------------------------
def _linear_kernel(x_ref, w_ref, b_ref, o_ref):
    o_ref[...] = (
        jnp.dot(x_ref[...], w_ref[...], preferred_element_type=jnp.float32)
        + b_ref[...]
    )


def _row_tiled_linear(x2d, w, b, *, mxu_dtype=jnp.bfloat16):
    n0, din = x2d.shape
    dout = w.shape[1]
    n = ((n0 + 7) // 8) * 8           # pad rows to a sublane multiple -> tiling never degenerates
    if n != n0:
        x2d = jnp.pad(x2d, ((0, n - n0), (0, 0)))
    tm = _pick_tile(n, (512, 256, 128, 64, 32, 16, 8))
    out = pl.pallas_call(
        _linear_kernel,
        out_shape=jax.ShapeDtypeStruct((n, dout), jnp.float32),
        grid=(n // tm,),
        in_specs=[
            pl.BlockSpec((tm, din), lambda i: (i, 0)),
            pl.BlockSpec((din, dout), lambda i: (0, 0)),
            pl.BlockSpec((1, dout), lambda i: (0, 0)),
        ],
        out_specs=pl.BlockSpec((tm, dout), lambda i: (i, 0)),
        compiler_params=pltpu.CompilerParams(dimension_semantics=("parallel",)),
    )(x2d.astype(mxu_dtype), w.astype(mxu_dtype), b.reshape(1, dout).astype(jnp.float32))
    return out[:n0]


# ----------------------------------------------------------------------------
# Attention kernel: one (batch, L-chunk) per program; all heads lane-dense.
# Lane layouts: D = H*h (per-head vectors stacked), HH2 = H*h*h (per-head h x h state).
# ----------------------------------------------------------------------------
def _make_attn_kernel(Tl, D, H, h, eps, approx_recip):
    hh = h * h
    HH2 = H * hh

    def kernel(qkv_ref, tril_ref, ev_ref, ekk_ref, ctr_ref, sumh_ref, exphd_ref,
               exphx_ref, wgm_ref, qks_ref, wow_ref, wob_ref, wgb_ref,
               o_ref, Z_carry, g_carry, m_carry):
        chunk = pl.program_id(1)

        @pl.when(chunk == 0)
        def _init():
            Z_carry[...] = jnp.zeros_like(Z_carry)
            g_carry[...] = jnp.zeros_like(g_carry)
            m_carry[...] = jnp.full(m_carry.shape, NEG_INF, jnp.float32)

        mxu_dt = ev_ref.dtype          # bf16 in the fast path, f32 in exact mode

        qkv = qkv_ref[0]               # [Tl, 3D]  (f32)
        q = qkv[:, 0:D]
        k = qkv[:, D:2 * D]
        v = qkv[:, 2 * D:3 * D]

        # ---- per-head reductions (f32; N=H so this matmul is tiny).  Batched: one MXU pass
        #      for q.k (sim), |k|^2 and |v|^2 instead of three separate ones. ----
        stacked = jnp.concatenate([q * k, k * k, v * v], axis=0)              # [3Tl, D]
        red = jnp.dot(stacked, sumh_ref[...], preferred_element_type=jnp.float32)
        sim = red[0:Tl] * qks_ref[...]                                        # [Tl, H]
        k_inv = jax.lax.rsqrt(jnp.maximum(red[Tl:2 * Tl], 1e-24))             # = 1/max(|k|,1e-12)
        v_inv = jax.lax.rsqrt(jnp.maximum(red[2 * Tl:3 * Tl], 1e-24))

        # per-head F.normalize(dim=-1), f32
        kn = k * jnp.dot(k_inv, exphd_ref[...], preferred_element_type=jnp.float32)
        vn = v * jnp.dot(v_inv, exphd_ref[...], preferred_element_type=jnp.float32)

        # ---- one-hot lane expansions on the MXU (bf16 operands, f32 accumulate).
        #      vn and q share the same expansion matrix -> batch along sublanes. ----
        vq = jnp.concatenate([vn, q], axis=0).astype(mxu_dt)                  # [2Tl, D]
        vq_x = jnp.dot(vq, ev_ref[...], preferred_element_type=jnp.float32)   # [2Tl, HH2]
        v_x = vq_x[0:Tl]                  # vn[l, head, d] broadcast to lane (head, d, e)
        q_x = vq_x[Tl:2 * Tl]             # q [l, head, d] broadcast to lane (head, d, e)
        k_x = jnp.dot(kn.astype(mxu_dt), ekk_ref[...],
                      preferred_element_type=jnp.float32)                     # kv_norm_scale folded
        Zf = v_x * k_x                                                        # [Tl, HH2]

        # gates = sq_relu(wg(Z)) + eps (block-diagonal wg; kept f32: K=HH2 but N=H -> cheap)
        gl = jnp.dot(Zf, wgm_ref[...], preferred_element_type=jnp.float32) + wgb_ref[0, 0]
        gates = jnp.square(jnp.maximum(gl, 0.0)) + eps                        # [Tl, H]
        gZf = Zf * jnp.dot(gates, exphx_ref[...], preferred_element_type=jnp.float32)

        # ---- fused within-chunk cumulative sums: ONE tril matmul over [gZf | gates];
        #      carries added in f32 (accumulation precision preserved across chunks). ----
        fused = jnp.concatenate([gZf, gates], axis=1).astype(mxu_dt)          # [Tl, HH2+H]
        scan = jnp.dot(tril_ref[...], fused, preferred_element_type=jnp.float32)
        Z_scan = scan[:, 0:HH2] + Z_carry[...]                                # [Tl, HH2]
        g_scan = scan[:, HH2:HH2 + H] + g_carry[...]                          # [Tl, H]

        # ---- within-chunk cumulative max: log-step roll scan (XLU slot) + carry ----
        rows = jax.lax.broadcasted_iota(jnp.int32, (Tl, H), 0)
        m = sim
        off = 1
        while off < Tl:
            m = jnp.maximum(m, jnp.where(rows < off, NEG_INF,
                                         pltpu.roll(m, shift=off, axis=0)))
            off *= 2
        m_scan = jnp.maximum(m, m_carry[...])                                 # [Tl, H]

        # carry running totals (chunk axis MUST remain the innermost "arbitrary" grid axis)
        Z_carry[...] = Z_scan[Tl - 1:Tl, :]
        g_carry[...] = g_scan[Tl - 1:Tl, :]
        m_carry[...] = m_scan[Tl - 1:Tl, :]

        # ---- softmax / gating factor (all f32; s-leaves of the scan are zero -> /eps) ----
        softmax_w = jnp.exp(sim - m_scan) * (1.0 / eps)                       # [Tl, H]
        sig = pl.reciprocal(1.0 + jnp.exp(-softmax_w), approx=approx_recip)
        factor = 1.0 + softmax_w * sig                                        # 1 + silu
        coef = factor * pl.reciprocal(g_scan + eps, approx=approx_recip)      # [Tl, H]

        # ---- context: contract over d first (bf16 MXU), then apply per-head coef in f32 ----
        ctxt = jnp.dot((q_x * Z_scan).astype(mxu_dt), ctr_ref[...],
                       preferred_element_type=jnp.float32)                    # [Tl, D]
        ctxt = ctxt * jnp.dot(coef, exphd_ref[...], preferred_element_type=jnp.float32)

        # fused output projection (wo) epilogue; output written lane-dense in (B, L, D)
        o_ref[0] = (jnp.dot(ctxt.astype(mxu_dt), wow_ref[...],
                            preferred_element_type=jnp.float32) + wob_ref[...])

    return kernel


# ----------------------------------------------------------------------------
# Head-structured one-hot constants (host-built, resident in VMEM)
# ----------------------------------------------------------------------------
def _build_head_constants(H, h, kv_norm_scale, wg_w, mxu_dtype):
    D, hh = H * h, h * h
    HH2 = H * hh
    iD = jnp.arange(D)
    jX = jnp.arange(HH2)
    head_D, d_D = iD // h, iD % h
    head_X, d_X, e_X = jX // hh, (jX % hh) // h, jX % h
    same = head_D[:, None] == head_X[None, :]
    ev = (same & (d_D[:, None] == d_X[None, :])).astype(jnp.float32)        # [D, HH2]
    ek = (same & (d_D[:, None] == e_X[None, :])).astype(jnp.float32)        # [D, HH2]
    kvs = kv_norm_scale.reshape(HH2).astype(jnp.float32)
    ekk = ek * kvs[None, :]                                                 # kv_norm_scale folded
    ctr = ek.T                                                              # [HH2, D] contract d
    sumh = (head_D[:, None] == jnp.arange(H)[None, :]).astype(jnp.float32)  # [D, H]
    exphd = sumh.T                                                          # [H, D]
    exphx = (jnp.arange(H)[:, None] == head_X[None, :]).astype(jnp.float32) # [H, HH2]
    wgm = exphx.T * jnp.tile(wg_w.reshape(hh), H)[:, None]                  # [HH2, H] block-diag wg
    # ev/ekk/ctr feed the big bf16 matmuls (exact 0/1 or learned scale); the small f32-path
    # matrices (sumh/exphd/exphx/wgm) stay f32.
    return (ev.astype(mxu_dtype), ekk.astype(mxu_dtype), ctr.astype(mxu_dtype),
            sumh, exphd, exphx, wgm)


# ----------------------------------------------------------------------------
# Module forward
# ----------------------------------------------------------------------------
def associative_attention(x, params, num_heads, head_dim, eps=EPS, chunk_len=None,
                          mxu_dtype=jnp.bfloat16):
    B, L, D = x.shape
    H, h = num_heads, head_dim
    assert H * h == D and h * h == D, "wg requires head_dim**2 == dim"
    HH2 = H * h * h
    mxu_dtype = jnp.dtype(mxu_dtype)
    approx_recip = mxu_dtype == jnp.dtype(jnp.bfloat16)

    # ---- fused QKV projection: one HBM pass over x, row-tiled, parallel grid ----
    wqkv = jnp.concatenate([params["wq_w"], params["wk_w"], params["wv_w"]], axis=1)  # [D, 3D]
    bqkv = jnp.concatenate([params["wq_b"], params["wk_b"], params["wv_b"]], axis=0)  # [3D]
    qkv = _row_tiled_linear(x.reshape(B * L, D), wqkv, bqkv,
                            mxu_dtype=mxu_dtype).reshape(B, L, 3 * D)

    # TODO(synk): spectral_basis / tensordot_conv / full_conv are undefined in the provided
    # module (spectral_filters=None in __init__); the spectral filtering step is identity here.

    ev, ekk, ctr, sumh, exphd, exphx, wgm = _build_head_constants(
        H, h, params["kv_norm_scale"], params["wg_w"], mxu_dtype)
    qk_scale = params["qk_norm_scale"].reshape(1, H).astype(jnp.float32)
    wo_w = params["wo_w"].astype(mxu_dtype)
    wo_b = params["wo_b"].reshape(1, D).astype(jnp.float32)
    wg_b = params["wg_b"].reshape(1, 1).astype(jnp.float32)

    # ---- per-generation VMEM budget (v7x: 64 MiB/TC vs 128 MiB on v5e/v6e) ----
    vmem_cap = _tpu_vmem_capacity_bytes()
    small_vmem = vmem_cap < (100 << 20)
    if chunk_len is None:
        cands = (128, 64, 32, 16, 8) if small_vmem else (256, 128, 64, 32, 16, 8)
        Tl = _pick_tile(L, cands)
    else:
        Tl = chunk_len
    assert L % Tl == 0, "sequence length must be divisible by the chunk length"
    nchunks = L // Tl
    vmem_limit = max(min(vmem_cap * 5 // 8, 80 << 20), 32 << 20)

    tril = (jnp.arange(Tl)[:, None] >= jnp.arange(Tl)[None, :]).astype(mxu_dtype)
    kernel = _make_attn_kernel(Tl, D, H, h, eps, approx_recip)

    # TODO(synk): on v7x (2 TensorCores) add a parallel head-group grid axis (heads are fully
    # independent) so unit/odd batch sizes still use both cores.
    # TODO(synk): for D >= 512 switch to the chunked per-head [h,h]-state formulation to drop
    # the D x HH2 constants and the [Tl, HH2] temporaries.

    def _call(single_buffer_consts):
        def cspec(shape):
            kw = {"pipeline_mode": pl.Buffered(1)} if single_buffer_consts else {}
            return pl.BlockSpec(shape, lambda b, c: (0, 0), **kw)

        return pl.pallas_call(
            kernel,
            out_shape=jax.ShapeDtypeStruct((B, L, D), jnp.float32),
            grid=(B, nchunks),        # chunk axis innermost + "arbitrary": required for carries
            in_specs=[
                pl.BlockSpec((1, Tl, 3 * D), lambda b, c: (b, c, 0)),   # qkv stream (no transpose)
                cspec((Tl, Tl)),        # tril (resident constant)
                cspec((D, HH2)),        # ev
                cspec((D, HH2)),        # ekk (kv_norm_scale folded)
                cspec((HH2, D)),        # ctr
                cspec((D, H)),          # sumh
                cspec((H, D)),          # exphd
                cspec((H, HH2)),        # exphx
                cspec((HH2, H)),        # wg (block-diagonal)
                cspec((1, H)),          # qk_norm_scale
                cspec((D, D)),          # wo weight (fused epilogue)
                cspec((1, D)),          # wo bias
                pl.BlockSpec((1, 1), lambda b, c: (0, 0),
                             memory_space=pltpu.MemorySpace.SMEM),      # wg bias (scalar)
            ],
            out_specs=pl.BlockSpec((1, Tl, D), lambda b, c: (b, c, 0)),  # (B, L, D), lane-dense
            scratch_shapes=[
                pltpu.VMEM((1, HH2), jnp.float32),   # Z carry across L-chunks
                pltpu.VMEM((1, H), jnp.float32),     # g carry
                pltpu.VMEM((1, H), jnp.float32),     # m carry
            ],
            compiler_params=pltpu.CompilerParams(
                dimension_semantics=("parallel", "arbitrary"),
                vmem_limit_bytes=int(vmem_limit)),
        )(qkv, tril, ev, ekk, ctr, sumh, exphd, exphx, wgm, qk_scale, wo_w, wo_b, wg_b)

    try:
        return _call(True)
    except Exception:
        # pl.Buffered(1) single-buffering of the resident constants is purely a VMEM
        # optimization; fall back to default double-buffering if this JAX rejects it.
        return _call(False)


# ----------------------------------------------------------------------------
# Deterministic parameter init (same shapes as the PyTorch __init__)
# ----------------------------------------------------------------------------
def init_params(key, dim, num_heads, head_dim):
    ks = jax.random.split(key, 10)

    def lin(kw, kb, din, dout):
        bound = 1.0 / math.sqrt(din)
        w = jax.random.uniform(kw, (din, dout), jnp.float32, -bound, bound)
        b = jax.random.uniform(kb, (dout,), jnp.float32, -bound, bound)
        return w, b

    wq_w, wq_b = lin(ks[0], ks[1], dim, dim)
    wk_w, wk_b = lin(ks[2], ks[3], dim, dim)
    wv_w, wv_b = lin(ks[4], ks[5], dim, dim)
    wo_w, wo_b = lin(ks[6], ks[7], dim, dim)
    wg_w, wg_b = lin(ks[8], ks[9], dim, 1)
    return {
        "wq_w": wq_w, "wq_b": wq_b,
        "wk_w": wk_w, "wk_b": wk_b,
        "wv_w": wv_w, "wv_b": wv_b,
        "wo_w": wo_w, "wo_b": wo_b,
        "wg_w": wg_w, "wg_b": wg_b,
        "kv_norm_scale": jnp.ones((1, num_heads, 1, head_dim, head_dim), jnp.float32),
        "qk_norm_scale": jnp.full((1, num_heads, 1), 1.0 / math.sqrt(head_dim), jnp.float32),
    }


# ----------------------------------------------------------------------------
# Pure-JAX reference of the same forward pass (for validation)
# ----------------------------------------------------------------------------
def reference(x, p, H, h, eps=EPS):
    B, L, D = x.shape
    q = (x @ p["wq_w"] + p["wq_b"]).reshape(B, L, H, h).transpose(0, 2, 1, 3)
    k = (x @ p["wk_w"] + p["wk_b"]).reshape(B, L, H, h).transpose(0, 2, 1, 3)
    v = (x @ p["wv_w"] + p["wv_b"]).reshape(B, L, H, h).transpose(0, 2, 1, 3)
    sim = jnp.einsum("bhld,bhld->bhl", q, k) * p["qk_norm_scale"]
    kn = k / jnp.maximum(jnp.linalg.norm(k, axis=-1, keepdims=True), 1e-12)
    vn = v / jnp.maximum(jnp.linalg.norm(v, axis=-1, keepdims=True), 1e-12)
    Z = jnp.einsum("bhld,bhle->bhlde", vn, kn) * p["kv_norm_scale"]
    gate_inputs = Z.reshape(B, H, L, h * h)
    gl = gate_inputs @ p["wg_w"] + p["wg_b"]
    gates = jnp.square(jnp.maximum(gl, 0.0)) + eps
    gates5 = gates[..., None]
    gated_Z = gates5 * Z
    m_scan = jax.lax.cummax(sim, axis=2)
    Z_scan = jnp.cumsum(gated_Z, axis=2)
    g_scan = jnp.cumsum(gates5, axis=2)
    softmax_w = jnp.exp(sim - m_scan)[..., None, None] / (0.0 + eps)  # s_scan == 0
    gated_w = Z_scan / (g_scan + eps)
    attn = gated_w * (1.0 + jax.nn.silu(softmax_w))
    ctxt = jnp.einsum("bhld,bhlde->bhle", q, attn)
    ctxt = ctxt.transpose(0, 2, 1, 3).reshape(B, L, D)
    return ctxt @ p["wo_w"] + p["wo_b"]


if __name__ == "__main__":
    B, L = 2, 16
    H, h = 4, 4            # num_heads, head_dim  (head_dim**2 == dim, required by wg)
    dim = H * h            # 16

    key = jax.random.PRNGKey(0)
    pkey, xkey = jax.random.split(key)
    params = init_params(pkey, dim, H, h)
    x = jax.random.normal(xkey, (B, L, dim), jnp.float32)

    with jax.default_matmul_precision("highest"):
        ref = jax.block_until_ready(reference(x, params, H, h, EPS))
    scale = float(jnp.max(jnp.abs(ref))) + 1.0

    # chunk_len=8 exercises the multi-chunk carry path (grid chunk axis "arbitrary").
    # 1) exact-arithmetic mode (f32 MXU operands, exact reciprocals): tight validation.
    out_f32 = jax.block_until_ready(
        associative_attention(x, params, H, h, EPS, chunk_len=8, mxu_dtype=jnp.float32))
    err_f32 = float(jnp.max(jnp.abs(out_f32 - ref)))
    assert err_f32 <= 2e-3 * scale, f"f32-mode mismatch: max abs err {err_f32}, scale {scale}"

    # 2) production mode (bf16 MXU operands, f32 accumulation, approx EUP reciprocals):
    #    looser tolerance accounts for bf16 operand rounding on the MXU path.
    out = jax.block_until_ready(
        associative_attention(x, params, H, h, EPS, chunk_len=8))
    err_bf16 = float(jnp.max(jnp.abs(out - ref)))
    assert err_bf16 <= 5e-2 * scale, f"bf16-mode mismatch: max abs err {err_bf16}, scale {scale}"

    print("KERNEL_OK")
</pallas_src>

<mosaic_0001>
module attributes {stable_mosaic.version = 11 : i64} {
  func.func @_linear_kernel(%arg0: i32, %arg1: memref<32x16xf32, #tpu.memory_space<vmem>>, %arg2: memref<16x48xf32, #tpu.memory_space<vmem>>, %arg3: memref<1x48xf32, #tpu.memory_space<vmem>>, %arg4: memref<32x48xf32, #tpu.memory_space<vmem>>) attributes {dimension_semantics = [#tpu.dimension_semantics<parallel>], iteration_bounds = array<i64: 1>, scalar_prefetch = 0 : i64, scratch_operands = 0 : i64, tpu.core_type = #tpu.core_type<tc>, window_params = [{transform_indices = @transform_0, window_bounds = array<i64: 32, 16>}, {pipeline_mode = #tpu.pipeline_mode<synchronous>, transform_indices = @transform_1, window_bounds = array<i64: 16, 48>}, {pipeline_mode = #tpu.pipeline_mode<synchronous>, transform_indices = @transform_2, window_bounds = array<i64: 1, 48>}, {transform_indices = @transform_3, window_bounds = array<i64: 32, 48>}]} {
    %c0 = arith.constant 0 : index
    %c0_0 = arith.constant 0 : index
    %0 = vector.load %arg1[%c0, %c0_0] : memref<32x16xf32, #tpu.memory_space<vmem>>, vector<32x16xf32>
    %c0_1 = arith.constant 0 : index
    %c0_2 = arith.constant 0 : index
    %1 = vector.load %arg2[%c0_1, %c0_2] : memref<16x48xf32, #tpu.memory_space<vmem>>, vector<16x48xf32>
    %cst = arith.constant dense<0.000000e+00> : vector<32x48xf32>
    %2 = tpu.matmul %0, %1, %cst {dimension_numbers = #tpu.dot_dimension_numbers<[1], [0], [0], [1], [0, 0, 1, 1], [], []>} : vector<32x16xf32>, vector<16x48xf32>, vector<32x48xf32> -> vector<32x48xf32>
    %c0_3 = arith.constant 0 : index
    %c0_4 = arith.constant 0 : index
    %3 = vector.load %arg3[%c0_3, %c0_4] : memref<1x48xf32, #tpu.memory_space<vmem>>, vector<1x48xf32>
    %4 = vector.broadcast %3 : vector<1x48xf32> to vector<32x48xf32>
    %5 = arith.addf %2, %4 : vector<32x48xf32>
    %c0_5 = arith.constant 0 : index
    %c0_6 = arith.constant 0 : index
    %6 = vector.load %arg4[%c0_5, %c0_6] : memref<32x48xf32, #tpu.memory_space<vmem>>, vector<32x48xf32>
    tpu.vector_store %arg4[%c0_5, %c0_6], %5 {strides = array<i32>} : memref<32x48xf32, #tpu.memory_space<vmem>>, vector<32x48xf32>,
    return
  }
  func.func @transform_0(%arg0: i32) -> (i32, i32) {
    %c0_i32 = arith.constant 0 : i32
    %c0_i32_0 = arith.constant 0 : i32
    return %arg0, %c0_i32 : i32, i32
  }
  func.func @transform_1(%arg0: i32) -> (i32, i32) {
    %c0_i32 = arith.constant 0 : i32
    %c0_i32_0 = arith.constant 0 : i32
    %c0_i32_1 = arith.constant 0 : i32
    return %c0_i32, %c0_i32_0 : i32, i32
  }
  func.func @transform_2(%arg0: i32) -> (i32, i32) {
    %c0_i32 = arith.constant 0 : i32
    %c0_i32_0 = arith.constant 0 : i32
    %c0_i32_1 = arith.constant 0 : i32
    return %c0_i32, %c0_i32_0 : i32, i32
  }
  func.func @transform_3(%arg0: i32) -> (i32, i32) {
    %c0_i32 = arith.constant 0 : i32
    %c0_i32_0 = arith.constant 0 : i32
    return %arg0, %c0_i32 : i32, i32
  }
}

</mosaic_0001>

<bundles_post_ra>
// kernel: tpu_custom_call.1
= control target key start
LH: loop header
LB: loop body
LE: loop exit
PB: predicated region body
PF: predicated region fallthrough
CT: control target
= control target key end

     0   :  { %vm28_vm0 = vcmask 130048   ;;  %s244_s0 = inlined_call_operand.vmem [shape: f32[32,16], index: 0, kind: input, shape index: {}]   ;;  %s245_s1 = inlined_call_operand.vmem [shape: f32[16,48], index: 1, kind: input, shape index: {}]   ;;  %s246_s2 = inlined_call_operand.vmem [shape: f32[1,48], index: 2, kind: input, shape index: {}]   ;;  %s247_s3 = inlined_call_operand.hbm [shape: f32[32,48], index: 3, kind: output, shape index: {}]  }
   0x1   :  { %v20_v0 = vld [vmem:[%s245_s1 + $0x8] sm:$0xff]  ;;  %v19_v1 = vld [vmem:[%s245_s1] sm:$0xff]  ;;  %v17_v3 = vld [vmem:[%s244_s0 + $0x10] sm:$0xff] }
   0x2   :  { %158 = vmatprep.subr.mxu0 %v20_v0  ;;  %168 = vmatprep.subr.mxu1 %v20_v0  ;;  %v15_v2 = vld [vmem:[%s244_s0] sm:$0xff] }
   0x3   :  { %159 = vmatpush3.msra.mxu0 %v20_v0  ;;  %170 = vmatpush3.msra.mxu1 %v20_v0 }
   0x4   :  { %8 = vsyncpa [#allocation3], 0  ;;  %160 = vmatprep.subr.mxu0 %v19_v1  ;;  %169 = vmatprep.subr.mxu1 %v19_v1  ;;  %v16_v4 = vld [vmem:[%s244_s0 + $0x8] sm:$0xff]  ;;  %v18_v5 = vld [vmem:[%s244_s0 + $0x18] sm:$0xff]  ;;  %s197_s25 = smov [#allocation2]   ;;  %vm126_vm1 = vcmask 392192  }
   0x5   :  { %161 = vmatpush3.msra.mxu0 %v19_v1  ;;  %171 = vmatpush3.msra.mxu1 %v19_v1  ;;  %v147_v6 = vld [vmem:[%s246_s2] ss:$0 sm:$0xff]  ;;  %s136_s26 = sshll.u32 %s197_s25, 4  ;;  %s137_s26 = int_to_ptr.vmem [resolvable:$true] %s136_s26 }
   0x6   :  { %162 = vmatprep.mubr.msk.f32.mxu0 %vm28_vm0, %v15_v2  ;;  %165 = vmatprep.mubr.msk.f32.mxu1 %vm28_vm0, %v17_v3  ;;  %s175_s0 = scalar_lea.vmem %s137_s26, 512  ;;  %p180_p1 = scmp.lt.s32.totalorder %s137_s26, %s137_s26 }
   0x7   :  { %163 = vmatmul.mubr.msk.f32.vlgmr.msra.gmra.mxu0 %vm28_vm0, %v16_v4  ;;  %166 = vmatmul.mubr.msk.f32.vlgmr.msra.gmra.mxu1 %vm28_vm0, %v18_v5  ;;  %p176_p0 = scmp.ne.s32.totalorder %s137_s26, %s175_s0  ;;  %p181_p2 = scmp.lt.s32.totalorder %s175_s0, %s175_s0 }
   0x9   :  { %p182_p3 = por %p181_p2, %p180_p1 }
   0xb   :  { %p183_p4 = pnand %p182_p3, %p176_p0 }
  0xc7   :  { %v164_v7 = vpop.f32.mrf.mxu0  ;;  %v167_v8 = vpop.f32.mrf.mxu1 }
  0xc8   :  { %v113_v9 = vadd.f32 %v164_v7, %v147_v6  ;;  %v123_v10 = vadd.f32 %v167_v8, %v147_v6 }
  0xc9   :  { %v107_v11 = vpop.f32.mrf.mxu0  ;;  %v117_v12 = vpop.f32.mrf.mxu1 }
  0xca   :  { %128 = vst.msk [vmem:[#allocation2 + $0x8] sm:$0xff] %vm126_vm1, %v113_v9  ;;  %130 = vst.msk [vmem:[#allocation2 + $0x18] sm:$0xff] %vm126_vm1, %v123_v10  ;;  %v108_v13 = vadd.f32 %v147_v6, %v107_v11  ;;  %v118_v14 = vadd.f32 %v147_v6, %v117_v12 }
  0xcc   :  { %127 = vst.msk [vmem:[#allocation2] sm:$0xff] %vm126_vm1, %v108_v13  ;;  %129 = vst.msk [vmem:[#allocation2 + $0x10] sm:$0xff] %vm126_vm1, %v118_v14 }
  0xcd   :  { %186 = shalt.err (!%p183_p4)
}
  0xce   :  { %s198_s2 = smov 128   ;;  %s199_s27 = smov 8  }
  0xcf   :  { %142 = dma.vmem_to_hbm [thread:$0]  %s137_s26, 512, %s247_s3, [#allocation3], %s198_s2, %s198_s2, %s199_s27  }
  0xd0   :  { %195 = dma.done.wait [#allocation3], 512  }
  0xd1   :  { %196 = vsyncadd [#allocation3], 4294966784 }
  0xd2   :  { %146 = vsyncpa [#allocation3], 1 }

</bundles_post_ra>
